<compile_context>
chip_gen: v5e
topology: v5e:2x2
jax: 0.10.0
libtpu: 0.0.40
codegen_flags: <defaults>
</compile_context>

<pallas_src>
import functools
import math

import jax
import jax.numpy as jnp
from jax.experimental import pallas as pl
from jax.experimental.pallas import tpu as pltpu


def _round_up(n, m):
    return ((n + m - 1) // m) * m


def _layer_norm_f32(y, gamma, beta, eps):
    mean = jnp.mean(y, axis=-1, keepdims=True)
    centered = y - mean
    var = jnp.mean(centered * centered, axis=-1, keepdims=True)
    normed = centered * jax.lax.rsqrt(var + eps)
    return normed * gamma.astype(jnp.float32) + beta.astype(jnp.float32)


def _ffn_ln_resident_kernel(x_ref, w1_ref, b1_ref, w2_ref, b2_ref,
                            gamma_ref, beta_ref, o_ref, *, eps):
    """Whole w1/w2 resident in VMEM; single grid axis over row tiles."""
    x = x_ref[...]  # (tile_rows, d_in), caller's dtype (f32 or bf16)
    h = jnp.dot(x, w1_ref[...], preferred_element_type=jnp.float32)
    h = jnp.maximum(h + b1_ref[...].astype(jnp.float32), 0.0)
    y = jnp.dot(h.astype(w2_ref.dtype), w2_ref[...],
                preferred_element_type=jnp.float32)
    y = y + b2_ref[...].astype(jnp.float32) + x.astype(jnp.float32)
    o_ref[...] = _layer_norm_f32(y, gamma_ref[...], beta_ref[...], eps).astype(o_ref.dtype)


def _ffn_ln_streaming_kernel(x_ref, w1_ref, b1_ref, w2_ref, b2_ref,
                             gamma_ref, beta_ref, o_ref, acc_ref, *, eps):
    """Weights streamed by d_hid slices; grid = (row_tiles, hid_tiles), hid axis last."""
    k = pl.program_id(1)

    @pl.when(k == 0)
    def _():
        acc_ref[...] = jnp.zeros_like(acc_ref)

    x = x_ref[...]
    h = jnp.dot(x, w1_ref[...], preferred_element_type=jnp.float32)
    h = jnp.maximum(h + b1_ref[...].astype(jnp.float32), 0.0)
    acc_ref[...] += jnp.dot(h.astype(w2_ref.dtype), w2_ref[...],
                            preferred_element_type=jnp.float32)

    @pl.when(k == pl.num_programs(1) - 1)
    def _():
        y = acc_ref[...] + b2_ref[...].astype(jnp.float32) + x.astype(jnp.float32)
        o_ref[...] = _layer_norm_f32(y, gamma_ref[...], beta_ref[...], eps).astype(o_ref.dtype)


def positionwise_feed_forward(x, w1, b1, w2, b2, gamma, beta, *,
                              eps=1e-6, tile_rows=None, tile_hid=None,
                              mode="auto", vmem_budget_bytes=None):
    """x: (..., d_in). Returns LayerNorm(x + FFN(x)), same shape/dtype as x.

    mode: "auto" (prefer full-weight VMEM residency when it fits), "resident", "streaming".
    """
    orig_shape = x.shape
    d_in = orig_shape[-1]
    d_hid = w1.shape[1]
    rows = math.prod(orig_shape[:-1])
    x2d = x.reshape(rows, d_in)

    b1 = b1.reshape(1, d_hid)
    b2 = b2.reshape(1, d_in)
    gamma = gamma.reshape(1, d_in)
    beta = beta.reshape(1, d_in)

    x_bytes = jnp.dtype(x.dtype).itemsize
    w_bytes = jnp.dtype(w1.dtype).itemsize

    # Generation-aware VMEM budget (v5e/v6e: 128 MiB physical, v7x: 64 MiB per TC).
    if vmem_budget_bytes is None:
        try:
            cap = int(pltpu.get_tpu_info().vmem_capacity_bytes)
        except Exception:
            cap = 128 * 1024 * 1024
        vmem_budget_bytes = int(0.75 * cap)
    vmem_limit = int(max(32 * 1024 * 1024, vmem_budget_bytes))

    rows8 = max(8, _round_up(rows, 8))
    small_bytes = 2 * (d_hid + 3 * d_in) * max(w_bytes, x_bytes)  # b1, b2, gamma, beta (2x buf)

    def resident_bytes(tr):
        # Conservative: weights counted double-buffered even though the constant block
        # index means they are DMA'd only once.
        return (2 * 2 * d_in * d_hid * w_bytes        # w1 + w2, double-buffered
                + small_bytes
                + 4 * tr * d_in * x_bytes             # x + out tiles, double-buffered
                + tr * d_hid * 4                      # f32 hidden intermediate
                + 2 * tr * d_in * 4)                  # f32 epilogue temporaries

    def streaming_bytes(tr, th):
        return (4 * tr * d_in * x_bytes
                + 2 * d_in * th * w_bytes             # w1 slice, double-buffered
                + 2 * th * d_in * w_bytes             # w2 slice, double-buffered
                + small_bytes
                + tr * d_in * 4                       # f32 accumulator scratch
                + tr * th * 4                         # f32 hidden intermediate
                + 2 * tr * d_in * 4)                  # f32 epilogue temporaries

    row_candidates = ([max(8, _round_up(tile_rows, 8))] if tile_rows is not None
                      else [1024, 512, 256, 128, 64, 32, 16, 8])

    # ---------------- Resident mode: weights live in VMEM, fetched once ----------------
    resident_rows = None
    if mode in ("auto", "resident"):
        for cand in row_candidates:
            tr = min(cand, rows8)
            if resident_bytes(tr) <= vmem_budget_bytes:
                resident_rows = tr
                break
        if resident_rows is None and mode == "resident":
            resident_rows = min(row_candidates[-1], rows8)

    if resident_rows is not None:
        tr = resident_rows
        padded_rows = _round_up(rows, tr)
        if padded_rows != rows:
            x2d = jnp.pad(x2d, ((0, padded_rows - rows), (0, 0)))
        grid = (padded_rows // tr,)

        cost = pl.CostEstimate(
            flops=4 * rows * d_in * d_hid,
            transcendentals=rows,
            bytes_accessed=(2 * rows * d_in * x_bytes
                            + 2 * d_in * d_hid * w_bytes
                            + (d_hid + 3 * d_in) * w_bytes))

        out2d = pl.pallas_call(
            functools.partial(_ffn_ln_resident_kernel, eps=eps),
            out_shape=jax.ShapeDtypeStruct((padded_rows, d_in), x.dtype),
            grid_spec=pltpu.PrefetchScalarGridSpec(
                num_scalar_prefetch=0,
                grid=grid,
                in_specs=[
                    pl.BlockSpec((tr, d_in), lambda i: (i, 0)),       # x tile (streamed)
                    pl.BlockSpec((d_in, d_hid), lambda i: (0, 0)),    # w1 (resident, fetched once)
                    pl.BlockSpec((1, d_hid), lambda i: (0, 0)),       # b1
                    pl.BlockSpec((d_hid, d_in), lambda i: (0, 0)),    # w2 (resident, fetched once)
                    pl.BlockSpec((1, d_in), lambda i: (0, 0)),        # b2
                    pl.BlockSpec((1, d_in), lambda i: (0, 0)),        # gamma
                    pl.BlockSpec((1, d_in), lambda i: (0, 0)),        # beta
                ],
                out_specs=pl.BlockSpec((tr, d_in), lambda i: (i, 0)),
            ),
            compiler_params=pltpu.CompilerParams(
                dimension_semantics=("parallel",),
                vmem_limit_bytes=vmem_limit),
            cost_estimate=cost,
        )(x2d, w1, b1, w2, b2, gamma, beta)
        return out2d[:rows].reshape(orig_shape)

    # ---------------- Streaming mode: d_hid tiled, weights re-streamed per row tile ----------------
    # Pad d_hid to a 128 multiple so w1/w2 can be sliced lane/sublane-aligned.  Zero-padded
    # hidden columns contribute exactly zero (relu(0)=0, zero w2 rows), so this is exact.
    d_hid_p = _round_up(d_hid, 128)
    if d_hid_p != d_hid:
        w1 = jnp.pad(w1, ((0, 0), (0, d_hid_p - d_hid)))
        b1 = jnp.pad(b1, ((0, 0), (0, d_hid_p - d_hid)))
        w2 = jnp.pad(w2, ((0, d_hid_p - d_hid), (0, 0)))

    # Largest 128-multiple divisor of (padded) d_hid, capped at the desired tile size.
    desired_hid = tile_hid if tile_hid is not None else 2048
    desired_hid = max(128, (min(desired_hid, d_hid_p) // 128) * 128)
    th = 128
    c = desired_hid
    while c >= 128:
        if d_hid_p % c == 0:
            th = c
            break
        c -= 128

    tr = None
    for cand in row_candidates:
        t = min(cand, rows8)
        if streaming_bytes(t, th) <= vmem_budget_bytes:
            tr = t
            break
    if tr is None:
        if tile_hid is None:
            th = 128
        tr = min(row_candidates[-1], rows8)

    padded_rows = _round_up(rows, tr)
    if padded_rows != rows:
        x2d = jnp.pad(x2d, ((0, padded_rows - rows), (0, 0)))
    grid = (padded_rows // tr, d_hid_p // th)

    cost = pl.CostEstimate(
        flops=4 * rows * d_in * d_hid_p,
        transcendentals=rows,
        bytes_accessed=(2 * rows * d_in * x_bytes
                        + grid[0] * 2 * d_in * d_hid_p * w_bytes   # weights re-streamed per row tile
                        + (d_hid_p + 3 * d_in) * w_bytes))

    out2d = pl.pallas_call(
        functools.partial(_ffn_ln_streaming_kernel, eps=eps),
        out_shape=jax.ShapeDtypeStruct((padded_rows, d_in), x.dtype),
        grid_spec=pltpu.PrefetchScalarGridSpec(
            num_scalar_prefetch=0,
            grid=grid,
            in_specs=[
                pl.BlockSpec((tr, d_in), lambda i, k: (i, 0)),        # x tile
                pl.BlockSpec((d_in, th), lambda i, k: (0, k)),        # w1 slice
                pl.BlockSpec((1, th), lambda i, k: (0, k)),           # b1 slice
                pl.BlockSpec((th, d_in), lambda i, k: (k, 0)),        # w2 slice
                pl.BlockSpec((1, d_in), lambda i, k: (0, 0)),         # b2
                pl.BlockSpec((1, d_in), lambda i, k: (0, 0)),         # gamma
                pl.BlockSpec((1, d_in), lambda i, k: (0, 0)),         # beta
            ],
            out_specs=pl.BlockSpec((tr, d_in), lambda i, k: (i, 0)),
            scratch_shapes=[pltpu.VMEM((tr, d_in), jnp.float32)],
        ),
        compiler_params=pltpu.CompilerParams(
            dimension_semantics=("parallel", "arbitrary"),
            vmem_limit_bytes=vmem_limit),
        cost_estimate=cost,
    )(x2d, w1, b1, w2, b2, gamma, beta)
    return out2d[:rows].reshape(orig_shape)


def _reference(x, w1, b1, w2, b2, gamma, beta, eps=1e-6):
    xf = x.astype(jnp.float32)
    h = jnp.maximum(xf @ w1.astype(jnp.float32) + b1.astype(jnp.float32), 0.0)
    y = h @ w2.astype(jnp.float32) + b2.astype(jnp.float32) + xf
    mean = jnp.mean(y, axis=-1, keepdims=True)
    var = jnp.mean((y - mean) ** 2, axis=-1, keepdims=True)
    return ((y - mean) * jax.lax.rsqrt(var + eps) * gamma.astype(jnp.float32)
            + beta.astype(jnp.float32))


if __name__ == "__main__":
    def make_params(key, d_in, d_hid, dtype):
        k_w1, k_b1, k_w2, k_b2 = jax.random.split(key, 4)
        lim1 = 1.0 / (d_in ** 0.5)
        lim2 = 1.0 / (d_hid ** 0.5)
        w1 = jax.random.uniform(k_w1, (d_in, d_hid), minval=-lim1, maxval=lim1).astype(dtype)
        b1 = jax.random.uniform(k_b1, (d_hid,), minval=-lim1, maxval=lim1).astype(dtype)
        w2 = jax.random.uniform(k_w2, (d_hid, d_in), minval=-lim2, maxval=lim2).astype(dtype)
        b2 = jax.random.uniform(k_b2, (d_in,), minval=-lim2, maxval=lim2).astype(dtype)
        gamma = jnp.ones((d_in,), dtype)
        beta = jnp.zeros((d_in,), dtype)
        return w1, b1, w2, b2, gamma, beta

    key = jax.random.PRNGKey(0)

    # --- Test 1: resident fast path (weights in VMEM, fetched once), f32, lane-dense d_in ---
    batch, seq, d_in, d_hid = 2, 8, 128, 256
    k_x, k_p = jax.random.split(key)
    x = jax.random.normal(k_x, (batch, seq, d_in), dtype=jnp.float32)
    params = make_params(k_p, d_in, d_hid, jnp.float32)
    out = jax.block_until_ready(positionwise_feed_forward(x, *params))
    ref = _reference(x, *params)
    assert out.shape == x.shape and out.dtype == x.dtype
    assert jnp.allclose(out, ref, atol=1e-4, rtol=1e-4), "test1 mismatch vs reference"

    # --- Test 2: forced streaming path: non-128-multiple d_hid (zero-pad), row padding,
    #             multi-step d_hid accumulation with the f32 scratch ---
    batch2, seq2, d_in2, d_hid2 = 3, 80, 128, 320     # rows=240 -> padded to 256; d_hid -> 384
    k_x2, k_p2 = jax.random.split(jax.random.PRNGKey(1))
    x2 = jax.random.normal(k_x2, (batch2, seq2, d_in2), dtype=jnp.float32)
    params2 = make_params(k_p2, d_in2, d_hid2, jnp.float32)
    out2 = jax.block_until_ready(
        positionwise_feed_forward(x2, *params2, mode="streaming",
                                  tile_rows=64, tile_hid=128))
    ref2 = _reference(x2, *params2)
    assert jnp.allclose(out2, ref2, atol=1e-4, rtol=1e-4), "test2 mismatch vs reference"

    # --- Test 3: bf16 activations/weights take the native bf16-MXU fast path (resident) ---
    xb = x.astype(jnp.bfloat16)
    params_b = tuple(p.astype(jnp.bfloat16) for p in params)
    outb = jax.block_until_ready(positionwise_feed_forward(xb, *params_b))
    assert outb.shape == xb.shape and outb.dtype == jnp.bfloat16
    assert float(jnp.max(jnp.abs(outb.astype(jnp.float32) - ref))) < 0.1, "bf16 smoke test"

    print("KERNEL_OK")
</pallas_src>

<mosaic_0001>
module attributes {stable_mosaic.version = 11 : i64} {
  func.func @_ffn_ln_resident_kernel(%arg0: i32, %arg1: memref<16x128xf32, #tpu.memory_space<vmem>>, %arg2: memref<128x256xf32, #tpu.memory_space<vmem>>, %arg3: memref<1x256xf32, #tpu.memory_space<vmem>>, %arg4: memref<256x128xf32, #tpu.memory_space<vmem>>, %arg5: memref<1x128xf32, #tpu.memory_space<vmem>>, %arg6: memref<1x128xf32, #tpu.memory_space<vmem>>, %arg7: memref<1x128xf32, #tpu.memory_space<vmem>>, %arg8: memref<16x128xf32, #tpu.memory_space<vmem>>) attributes {dimension_semantics = [#tpu.dimension_semantics<parallel>], iteration_bounds = array<i64: 1>, scalar_prefetch = 0 : i64, scratch_operands = 0 : i64, tpu.core_type = #tpu.core_type<tc>, window_params = [{transform_indices = @transform_0, window_bounds = array<i64: 16, 128>}, {pipeline_mode = #tpu.pipeline_mode<synchronous>, transform_indices = @transform_1, window_bounds = array<i64: 128, 256>}, {pipeline_mode = #tpu.pipeline_mode<synchronous>, transform_indices = @transform_2, window_bounds = array<i64: 1, 256>}, {pipeline_mode = #tpu.pipeline_mode<synchronous>, transform_indices = @transform_3, window_bounds = array<i64: 256, 128>}, {pipeline_mode = #tpu.pipeline_mode<synchronous>, transform_indices = @transform_4, window_bounds = array<i64: 1, 128>}, {pipeline_mode = #tpu.pipeline_mode<synchronous>, transform_indices = @transform_5, window_bounds = array<i64: 1, 128>}, {pipeline_mode = #tpu.pipeline_mode<synchronous>, transform_indices = @transform_6, window_bounds = array<i64: 1, 128>}, {transform_indices = @transform_7, window_bounds = array<i64: 16, 128>}]} {
    %c0 = arith.constant 0 : index
    %c0_0 = arith.constant 0 : index
    %0 = vector.load %arg1[%c0, %c0_0] : memref<16x128xf32, #tpu.memory_space<vmem>>, vector<16x128xf32>
    %c0_1 = arith.constant 0 : index
    %c0_2 = arith.constant 0 : index
    %1 = vector.load %arg2[%c0_1, %c0_2] : memref<128x256xf32, #tpu.memory_space<vmem>>, vector<128x256xf32>
    %cst = arith.constant dense<0.000000e+00> : vector<16x256xf32>
    %2 = tpu.matmul %0, %1, %cst {dimension_numbers = #tpu.dot_dimension_numbers<[1], [0], [0], [1], [0, 0, 1, 1], [], []>} : vector<16x128xf32>, vector<128x256xf32>, vector<16x256xf32> -> vector<16x256xf32>
    %c0_3 = arith.constant 0 : index
    %c0_4 = arith.constant 0 : index
    %3 = vector.load %arg3[%c0_3, %c0_4] : memref<1x256xf32, #tpu.memory_space<vmem>>, vector<1x256xf32>
    %4 = vector.broadcast %3 : vector<1x256xf32> to vector<16x256xf32>
    %5 = arith.addf %2, %4 : vector<16x256xf32>
    %cst_5 = arith.constant 0.000000e+00 : f32
    %6 = vector.broadcast %cst_5 : f32 to vector<16x256xf32>
    %7 = arith.maximumf %5, %6 : vector<16x256xf32>
    %c0_6 = arith.constant 0 : index
    %c0_7 = arith.constant 0 : index
    %8 = vector.load %arg4[%c0_6, %c0_7] : memref<256x128xf32, #tpu.memory_space<vmem>>, vector<256x128xf32>
    %cst_8 = arith.constant dense<0.000000e+00> : vector<16x128xf32>
    %9 = tpu.matmul %7, %8, %cst_8 {dimension_numbers = #tpu.dot_dimension_numbers<[1], [0], [0], [1], [0, 0, 1, 1], [], []>} : vector<16x256xf32>, vector<256x128xf32>, vector<16x128xf32> -> vector<16x128xf32>
    %c0_9 = arith.constant 0 : index
    %c0_10 = arith.constant 0 : index
    %10 = vector.load %arg5[%c0_9, %c0_10] : memref<1x128xf32, #tpu.memory_space<vmem>>, vector<1x128xf32>
    %11 = vector.broadcast %10 : vector<1x128xf32> to vector<16x128xf32>
    %12 = arith.addf %9, %11 : vector<16x128xf32>
    %13 = arith.addf %12, %0 : vector<16x128xf32>
    %c0_11 = arith.constant 0 : index
    %c0_12 = arith.constant 0 : index
    %14 = vector.load %arg6[%c0_11, %c0_12] : memref<1x128xf32, #tpu.memory_space<vmem>>, vector<1x128xf32>
    %c0_13 = arith.constant 0 : index
    %c0_14 = arith.constant 0 : index
    %15 = vector.load %arg7[%c0_13, %c0_14] : memref<1x128xf32, #tpu.memory_space<vmem>>, vector<1x128xf32>
    %cst_15 = arith.constant dense<0.000000e+00> : vector<16xf32>
    %16 = vector.multi_reduction <add>, %13, %cst_15 [1] : vector<16x128xf32> to vector<16xf32>
    %17 = vector.shape_cast %16 : vector<16xf32> to vector<16x1xf32>
    %cst_16 = arith.constant 1.280000e+02 : f32
    %18 = vector.broadcast %cst_16 : f32 to vector<16x1xf32>
    %19 = arith.divf %17, %18 : vector<16x1xf32>
    %20 = vector.broadcast %19 : vector<16x1xf32> to vector<16x128xf32>
    %21 = arith.subf %13, %20 : vector<16x128xf32>
    %22 = arith.mulf %21, %21 : vector<16x128xf32>
    %cst_17 = arith.constant dense<0.000000e+00> : vector<16xf32>
    %23 = vector.multi_reduction <add>, %22, %cst_17 [1] : vector<16x128xf32> to vector<16xf32>
    %24 = vector.shape_cast %23 : vector<16xf32> to vector<16x1xf32>
    %cst_18 = arith.constant 1.280000e+02 : f32
    %25 = vector.broadcast %cst_18 : f32 to vector<16x1xf32>
    %26 = arith.divf %24, %25 : vector<16x1xf32>
    %cst_19 = arith.constant 9.99999997E-7 : f32
    %27 = vector.broadcast %cst_19 : f32 to vector<16x1xf32>
    %28 = arith.addf %26, %27 : vector<16x1xf32>
    %29 = math.rsqrt %28 : vector<16x1xf32>
    %30 = vector.broadcast %29 : vector<16x1xf32> to vector<16x128xf32>
    %31 = arith.mulf %21, %30 : vector<16x128xf32>
    %32 = vector.broadcast %14 : vector<1x128xf32> to vector<16x128xf32>
    %33 = arith.mulf %31, %32 : vector<16x128xf32>
    %34 = vector.broadcast %15 : vector<1x128xf32> to vector<16x128xf32>
    %35 = arith.addf %33, %34 : vector<16x128xf32>
    %c0_20 = arith.constant 0 : index
    %c0_21 = arith.constant 0 : index
    %36 = vector.load %arg8[%c0_20, %c0_21] : memref<16x128xf32, #tpu.memory_space<vmem>>, vector<16x128xf32>
    tpu.vector_store %arg8[%c0_20, %c0_21], %35 {strides = array<i32>} : memref<16x128xf32, #tpu.memory_space<vmem>>, vector<16x128xf32>,
    return
  }
  func.func @transform_0(%arg0: i32) -> (i32, i32) {
    %c0_i32 = arith.constant 0 : i32
    %c0_i32_0 = arith.constant 0 : i32
    return %arg0, %c0_i32 : i32, i32
  }
  func.func @transform_1(%arg0: i32) -> (i32, i32) {
    %c0_i32 = arith.constant 0 : i32
    %c0_i32_0 = arith.constant 0 : i32
    %c0_i32_1 = arith.constant 0 : i32
    return %c0_i32, %c0_i32_0 : i32, i32
  }
  func.func @transform_2(%arg0: i32) -> (i32, i32) {
    %c0_i32 = arith.constant 0 : i32
    %c0_i32_0 = arith.constant 0 : i32
    %c0_i32_1 = arith.constant 0 : i32
    return %c0_i32, %c0_i32_0 : i32, i32
  }
  func.func @transform_3(%arg0: i32) -> (i32, i32) {
    %c0_i32 = arith.constant 0 : i32
    %c0_i32_0 = arith.constant 0 : i32
    %c0_i32_1 = arith.constant 0 : i32
    return %c0_i32, %c0_i32_0 : i32, i32
  }
  func.func @transform_4(%arg0: i32) -> (i32, i32) {
    %c0_i32 = arith.constant 0 : i32
    %c0_i32_0 = arith.constant 0 : i32
    %c0_i32_1 = arith.constant 0 : i32
    return %c0_i32, %c0_i32_0 : i32, i32
  }
  func.func @transform_5(%arg0: i32) -> (i32, i32) {
    %c0_i32 = arith.constant 0 : i32
    %c0_i32_0 = arith.constant 0 : i32
    %c0_i32_1 = arith.constant 0 : i32
    return %c0_i32, %c0_i32_0 : i32, i32
  }
  func.func @transform_6(%arg0: i32) -> (i32, i32) {
    %c0_i32 = arith.constant 0 : i32
    %c0_i32_0 = arith.constant 0 : i32
    %c0_i32_1 = arith.constant 0 : i32
    return %c0_i32, %c0_i32_0 : i32, i32
  }
  func.func @transform_7(%arg0: i32) -> (i32, i32) {
    %c0_i32 = arith.constant 0 : i32
    %c0_i32_0 = arith.constant 0 : i32
    return %arg0, %c0_i32 : i32, i32
  }
}

</mosaic_0001>

<bundles_post_ra>
// kernel: tpu_custom_call.1
= control target key start
LH: loop header
LB: loop body
LE: loop exit
PB: predicated region body
PF: predicated region fallthrough
CT: control target
= control target key end

     0   :  { %12 = vsyncpa [#allocation3], 0  ;;  %s574_s0 = inlined_call_operand.hbm [shape: f32[16,128], index: 0, kind: input, shape index: {}]   ;;  %s575_s1 = inlined_call_operand.hbm [shape: f32[128,256], index: 1, kind: input, shape index: {}]   ;;  %s576_s2 = inlined_call_operand.hbm [shape: f32[1,256], index: 2, kind: input, shape index: {}]   ;;  %s577_s3 = inlined_call_operand.hbm [shape: f32[256,128], index: 3, kind: input, shape index: {}]   ;;  %s578_s4 = inlined_call_operand.vmem [shape: f32[1,128], index: 4, kind: input, shape index: {}]   ;;  %s579_s5 = inlined_call_operand.vmem [shape: f32[1,128], index: 5, kind: input, shape index: {}]   ;;  %s580_s6 = inlined_call_operand.vmem [shape: f32[1,128], index: 6, kind: input, shape index: {}]   ;;  %s581_s7 = inlined_call_operand.hbm [shape: f32[16,128], index: 7, kind: output, shape index: {}]  }
   0x1   :  { %13 = vsyncpa [#allocation6], 0 }
   0x2   :  { %14 = vsyncpa [#allocation9], 0  ;;  %s33_s26 = sshll.u32 %s575_s1, 4  ;;  %s34_s26 = int_to_ptr.hbm [resolvable:$true] %s33_s26 }
   0x3   :  { %15 = vsyncpa [#allocation4], 0  ;;  %s491_s27 = smov [#allocation5]   ;;  %s20_s8 = sshll.u32 %s574_s0, 4  ;;  %s21_s8 = int_to_ptr.hbm [resolvable:$true] %s20_s8 }
   0x4   :  { %s35_s28 = sshll.u32 %s491_s27, 4  ;;  %s492_s9 = smov 256   ;;  %s36_s28 = int_to_ptr.vmem [resolvable:$true] %s35_s28 }
   0x5   :  { %s493_s10 = smov 16   ;;  %s494_s11 = smov [#allocation2]  }
   0x6   :  { %41 = dma.hbm_to_vmem [thread:$0]  %s34_s26, 4096, %s36_s28, [#allocation6], %s492_s9, %s492_s9, %s493_s10  }
   0x7   :  { %s22_s12 = sshll.u32 %s494_s11, 4  ;;  %s495_s13 = smov 128   ;;  %s23_s12 = int_to_ptr.vmem [resolvable:$true] %s22_s12 }
   0x8   :  { %s496_s14 = smov 8   ;;  %s47_s16 = sshll.u32 %s576_s2, 4  ;;  %s48_s16 = int_to_ptr.hbm [resolvable:$true] %s47_s16 }
   0x9   :  { %28 = dma.hbm_to_vmem [thread:$0]  %s21_s8, 256, %s23_s12, [#allocation3], %s495_s13, %s495_s13, %s496_s14  }
   0xa   :  { %s497_s17 = smov [#allocation7]   ;;  %s57_s20 = sshll.u32 %s577_s3, 4  ;;  %s58_s20 = int_to_ptr.hbm [resolvable:$true] %s57_s20 }
   0xb   :  { %s49_s0 = sshll.u32 %s497_s17, 4  ;;  %s498_s21 = smov [#allocation8]   ;;  %s50_s0 = int_to_ptr.vmem [resolvable:$true] %s49_s0 }
   0xc   :  { %52 = dma.hbm_to_vmem [thread:$0]  %s48_s16, 32, %s50_s0, [#allocation6]  }
   0xd   :  { %s59_s22 = sshll.u32 %s498_s21, 4  ;;  %s60_s22 = int_to_ptr.vmem [resolvable:$true] %s59_s22 }
   0xe   :  { %65 = dma.hbm_to_vmem [thread:$0]  %s58_s20, 4096, %s60_s22, [#allocation9], %s495_s13, %s495_s13, %s496_s14  }
   0xf   :  { %483 = dma.done.wait [#allocation3], 256  }
  0x10   :  { %484 = vsyncadd [#allocation3], 4294967040 }
  0x11   :  { %485 = dma.done.wait [#allocation6], 4128  }
  0x12   :  { %486 = vsyncadd [#allocation6], 4294963168 }
  0x13   :  { %487 = dma.done.wait [#allocation9], 4096  }
  0x14   :  { %488 = vsyncadd [#allocation9], 4294963200  ;;  %v120_v0 = vld [vmem:[#allocation5 + $0xf0] sm:$0xff]  ;;  %v118_v1 = vld [vmem:[#allocation5 + $0xe0] sm:$0xff]  ;;  %s500_s26 = smov [#allocation10]   ;;  %s329_s29 = sshll.u32 %s581_s7, 4  ;;  %s330_s29 = int_to_ptr.hbm [resolvable:$true] %s329_s29 }
  0x15   :  { %v121_v2 = vld [vmem:[#allocation5 + $0xf8] sm:$0xff]  ;;  %128 = vmatpush.msra.mxu0 %v120_v0  ;;  %v119_v3 = vld [vmem:[#allocation5 + $0xe8] sm:$0xff]  ;;  %v116_v4 = vld [vmem:[#allocation5 + $0xd0] sm:$0xff] }
  0x16   :  { %151 = vmatpush.msra.mxu1 %v121_v2  ;;  %v117_v5 = vld [vmem:[#allocation5 + $0xd8] sm:$0xff]  ;;  %v114_v6 = vld [vmem:[#allocation5 + $0xc0] sm:$0xff]  ;;  %v115_v7 = vld [vmem:[#allocation5 + $0xc8] sm:$0xff] }
  0x17   :  { %129 = vmatpush.msra.mxu0 %v118_v1  ;;  %v112_v8 = vld [vmem:[#allocation5 + $0xb0] sm:$0xff]  ;;  %v113_v9 = vld [vmem:[#allocation5 + $0xb8] sm:$0xff]  ;;  %v110_v10 = vld [vmem:[#allocation5 + $0xa0] sm:$0xff] }
  0x18   :  { %152 = vmatpush.msra.mxu1 %v119_v3  ;;  %v111_v11 = vld [vmem:[#allocation5 + $0xa8] sm:$0xff]  ;;  %v108_v12 = vld [vmem:[#allocation5 + $0x90] sm:$0xff]  ;;  %v109_v13 = vld [vmem:[#allocation5 + $0x98] sm:$0xff] }
  0x19   :  { %130 = vmatpush.msra.mxu0 %v116_v4  ;;  %v193_v14 = vld [vmem:[#allocation8 + $0x78] sm:$0xff]  ;;  %v192_v15 = vld [vmem:[#allocation8 + $0x70] sm:$0xff]  ;;  %v107_v17 = vld [vmem:[#allocation5 + $0x88] sm:$0xff] }
  0x1a   :  { %153 = vmatpush.msra.mxu1 %v117_v5  ;;  %v106_v16 = vld [vmem:[#allocation5 + $0x80] sm:$0xff]  ;;  %214 = vmatpush.msra.mxu2 %v193_v14  ;;  %v191_v19 = vld [vmem:[#allocation8 + $0x68] sm:$0xff]  ;;  %v208_v20 = vld [vmem:[#allocation8 + $0xf0] sm:$0xff] }
  0x1b   :  { %131 = vmatpush.msra.mxu0 %v114_v6  ;;  %v209_v18 = vld [vmem:[#allocation8 + $0xf8] sm:$0xff]  ;;  %v104_v21 = vld [vmem:[#allocation5 + $0x70] sm:$0xff]  ;;  %v190_v23 = vld [vmem:[#allocation8 + $0x60] sm:$0xff] }
  0x1c   :  { %154 = vmatpush.msra.mxu1 %v115_v7  ;;  %v105_v22 = vld [vmem:[#allocation5 + $0x78] sm:$0xff]  ;;  %215 = vmatpush.msra.mxu2 %v192_v15  ;;  %v207_v24 = vld [vmem:[#allocation8 + $0xe8] sm:$0xff]  ;;  %v102_v25 = vld [vmem:[#allocation5 + $0x60] sm:$0xff] }
  0x1d   :  { %132 = vmatpush.msra.mxu0 %v112_v8  ;;  %237 = vmatpush.msra.mxu3 %v209_v18  ;;  %v103_v26 = vld [vmem:[#allocation5 + $0x68] sm:$0xff]  ;;  %v189_v27 = vld [vmem:[#allocation8 + $0x58] sm:$0xff]  ;;  %v100_v29 = vld [vmem:[#allocation5 + $0x50] sm:$0xff] }
  0x1e   :  { %155 = vmatpush.msra.mxu1 %v113_v9  ;;  %216 = vmatpush.msra.mxu2 %v191_v19  ;;  %v206_v28 = vld [vmem:[#allocation8 + $0xe0] sm:$0xff]  ;;  %v101_v30 = vld [vmem:[#allocation5 + $0x58] sm:$0xff]  ;;  %v187_v35 = vld [vmem:[#allocation8 + $0x48] sm:$0xff] }
  0x1f   :  { %133 = vmatpush.msra.mxu0 %v110_v10  ;;  %238 = vmatpush.msra.mxu3 %v208_v20  ;;  %v98_v31 = vld [vmem:[#allocation5 + $0x40] sm:$0xff]  ;;  %v188_v32 = vld [vmem:[#allocation8 + $0x50] sm:$0xff]  ;;  %v99_v34 = vld [vmem:[#allocation5 + $0x48] sm:$0xff] }
  0x20   :  { %156 = vmatpush.msra.mxu1 %v111_v11  ;;  %217 = vmatpush.msra.mxu2 %v190_v23  ;;  %v205_v33 = vld [vmem:[#allocation8 + $0xd8] sm:$0xff]  ;;  %v204_v36 = vld [vmem:[#allocation8 + $0xd0] sm:$0xff]  ;;  %v186_v39 = vld [vmem:[#allocation8 + $0x40] sm:$0xff] }
  0x21   :  { %134 = vmatpush.msra.mxu0 %v108_v12  ;;  %239 = vmatpush.msra.mxu3 %v207_v24  ;;  %v96_v37 = vld [vmem:[#allocation5 + $0x30] sm:$0xff]  ;;  %v97_v38 = vld [vmem:[#allocation5 + $0x38] sm:$0xff]  ;;  %v94_v41 = vld [vmem:[#allocation5 + $0x20] sm:$0xff] }
  0x22   :  { %157 = vmatpush.msra.mxu1 %v109_v13  ;;  %218 = vmatpush.msra.mxu2 %v189_v27  ;;  %v203_v40 = vld [vmem:[#allocation8 + $0xc8] sm:$0xff]  ;;  %v185_v43 = vld [vmem:[#allocation8 + $0x38] sm:$0xff]  ;;  %v202_v44 = vld [vmem:[#allocation8 + $0xc0] sm:$0xff] }
  0x23   :  { %135 = vmatpush.msra.mxu0 %v106_v16  ;;  %240 = vmatpush.msra.mxu3 %v206_v28  ;;  %v95_v42 = vld [vmem:[#allocation5 + $0x28] sm:$0xff]  ;;  %v92_v45 = vld [vmem:[#allocation5 + $0x10] sm:$0xff]  ;;  %v93_v46 = vld [vmem:[#allocation5 + $0x18] sm:$0xff]  ;;  %v499_v28 = vmov 128.0  }
  0x24   :  { %158 = vmatpush.msra.mxu1 %v107_v17  ;;  %219 = vmatpush.msra.mxu2 %v188_v32  ;;  %v184_v47 = vld [vmem:[#allocation8 + $0x30] sm:$0xff]  ;;  %v201_v48 = vld [vmem:[#allocation8 + $0xb8] sm:$0xff]  ;;  %v91_v50 = vld [vmem:[#allocation5 + $0x8] sm:$0xff]  ;;  %357 = vrcp.f32 %v499_v28 }
  0x25   :  { %136 = vmatpush.msra.mxu0 %v104_v21  ;;  %241 = vmatpush.msra.mxu3 %v205_v33  ;;  %v90_v49 = vld [vmem:[#allocation5] sm:$0xff]  ;;  %v88_v51 = vld [vmem:[#allocation2] sm:$0xff]  ;;  %v89_v58 = vld [vmem:[#allocation2 + $0x8] sm:$0xff] }
  0x26   :  { %159 = vmatpush.msra.mxu1 %v105_v22  ;;  %220 = vmatpush.msra.mxu2 %v187_v35  ;;  %v183_v52 = vld [vmem:[#allocation8 + $0x28] sm:$0xff]  ;;  %v200_v53 = vld [vmem:[#allocation8 + $0xb0] sm:$0xff]  ;;  %v182_v54 = vld [vmem:[#allocation8 + $0x20] sm:$0xff] }
  0x27   :  { %137 = vmatpush.msra.mxu0 %v102_v25  ;;  %242 = vmatpush.msra.mxu3 %v204_v36  ;;  %v199_v55 = vld [vmem:[#allocation8 + $0xa8] sm:$0xff]  ;;  %v181_v56 = vld [vmem:[#allocation8 + $0x18] sm:$0xff]  ;;  %v198_v57 = vld [vmem:[#allocation8 + $0xa0] sm:$0xff] }
  0x28   :  { %160 = vmatpush.msra.mxu1 %v103_v26  ;;  %221 = vmatpush.msra.mxu2 %v186_v39  ;;  %v180_v59 = vld [vmem:[#allocation8 + $0x10] sm:$0xff]  ;;  %v197_v60 = vld [vmem:[#allocation8 + $0x98] sm:$0xff]  ;;  %v179_v61 = vld [vmem:[#allocation8 + $0x8] sm:$0xff] }
  0x29   :  { %138 = vmatpush.msra.mxu0 %v100_v29  ;;  %243 = vmatpush.msra.mxu3 %v203_v40  ;;  %v196_v62 = vld [vmem:[#allocation8 + $0x90] sm:$0xff]  ;;  %v178_v63 = vld [vmem:[#allocation8] sm:$0xff]  ;;  %v195_v0 = vld [vmem:[#allocation8 + $0x88] sm:$0xff] }
  0x2a   :  { %161 = vmatpush.msra.mxu1 %v101_v30  ;;  %222 = vmatpush.msra.mxu2 %v185_v43  ;;  %v194_v1 = vld [vmem:[#allocation8 + $0x80] sm:$0xff]  ;;  %v122_v2 = vld [vmem:[#allocation7] sm:$0x3]  ;;  %v354_v17 = vld [vmem:[%s578_s4] ss:$0 sm:$0xff]  ;;  %v358_v29 = vpop.eup %357 }
  0x2b   :  { %139 = vmatpush.msra.mxu0 %v98_v31  ;;  %244 = vmatpush.msra.mxu3 %v202_v44  ;;  %v124_v3 = vperm.slane %v122_v2, 0  ;;  %v125_v4 = vperm.slane %v122_v2, 1  ;;  %v269_v30 = vmul.f32 128.0, %v358_v29  ;;  %vm273_vm0 = vweird.f32 %v358_v29 }
  0x2c   :  { %162 = vmatpush.msra.mxu1 %v99_v34  ;;  %223 = vmatpush.msra.mxu2 %v184_v47 }
  0x2d   :  { %140 = vmatpush.msra.mxu0 %v96_v37  ;;  %245 = vmatpush.msra.mxu3 %v201_v48  ;;  %v270_v31 = vsub.f32 1.0, %v269_v30 }
  0x2e   :  { %163 = vmatpush.msra.mxu1 %v97_v38  ;;  %224 = vmatpush.msra.mxu2 %v183_v52 }
  0x2f   :  { %141 = vmatpush.msra.mxu0 %v94_v41  ;;  %246 = vmatpush.msra.mxu3 %v200_v53  ;;  %v271_v32 = vmul.f32 %v358_v29, %v270_v31 }
  0x30   :  { %164 = vmatpush.msra.mxu1 %v95_v42  ;;  %225 = vmatpush.msra.mxu2 %v182_v54 }
  0x31   :  { %142 = vmatpush.msra.mxu0 %v92_v45  ;;  %247 = vmatpush.msra.mxu3 %v199_v55  ;;  %v272_v33 = vadd.f32 %v358_v29, %v271_v32 }
  0x32   :  { %165 = vmatpush.msra.mxu1 %v93_v46  ;;  %226 = vmatpush.msra.mxu2 %v181_v56 }
  0x33   :  { %143 = vmatpush.msra.mxu0 %v90_v49  ;;  %248 = vmatpush.msra.mxu3 %v198_v57  ;;  %v274_v34 = vsel %vm273_vm0, %v358_v29, %v272_v33  ;;  %v355_v57 = vld [vmem:[%s579_s5] ss:$0 sm:$0xff]  ;;  %s327_s5 = sshll.u32 %s500_s26, 4  ;;  %s328_s5 = int_to_ptr.vmem [resolvable:$true] %s327_s5 }
  0x34   :  { %166 = vmatpush.msra.mxu1 %v91_v50  ;;  %144 = vmatmul.f32.vlgmr.msra.gmra.mxu0 %v88_v51 }
  0x35   :  { %167 = vmatmul.f32.vlgmr.msra.gmra.mxu1 %v88_v51  ;;  %227 = vmatpush.msra.mxu2 %v180_v59 }
  0x36   :  { %249 = vmatpush.msra.mxu3 %v197_v60 }
  0x37   :  { %228 = vmatpush.msra.mxu2 %v179_v61  ;;  %v356_v61 = vld [vmem:[%s580_s6] ss:$0 sm:$0xff] }
  0x38   :  { %250 = vmatpush.msra.mxu3 %v196_v62 }
  0x39   :  { %229 = vmatpush.msra.mxu2 %v178_v63 }
  0x3a   :  { %251 = vmatpush.msra.mxu3 %v195_v0 }
  0x3c   :  { %147 = vmatmul.f32.gmra.mxu0 %v89_v58  ;;  %252 = vmatpush.msra.mxu3 %v194_v1 }
  0x3d   :  { %170 = vmatmul.f32.gmra.mxu1 %v89_v58 }
  0xb1   :  { %v145_v5 = vpop.f32.mrf.mxu0 }
  0xb2   :  { %v168_v6 = vpop.f32.mrf.mxu1  ;;  %v146_v7 = vadd.f32 %v145_v5, %v124_v3 }
  0xb3   :  { %v169_v8 = vadd.f32 %v168_v6, %v125_v4 }
  0xb4   :  { %v174_v9 = vmax.f32 %v146_v7, 0.0 }
  0xb5   :  { %v175_v10 = vmax.f32 %v169_v8, 0.0 }
  0xb6   :  { %230 = vmatmul.f32.vlgmr.msra.gmra.mxu2 %v174_v9 }
  0xb7   :  { %253 = vmatmul.f32.vlgmr.msra.gmra.mxu3 %v175_v10 }
  0xb9   :  { %v148_v11 = vpop.f32.mrf.mxu0 }
  0xba   :  { %v171_v12 = vpop.f32.mrf.mxu1  ;;  %v149_v13 = vadd.f32 %v148_v11, %v124_v3 }
  0xbb   :  { %v172_v14 = vadd.f32 %v171_v12, %v125_v4 }
  0xbc   :  { %v176_v15 = vmax.f32 %v149_v13, 0.0 }
  0xbd   :  { %v177_v16 = vmax.f32 %v172_v14, 0.0 }
  0xbe   :  { %233 = vmatmul.f32.gmra.mxu2 %v176_v15 }
  0xbf   :  { %256 = vmatmul.f32.gmra.mxu3 %v177_v16 }
 0x139   :  { %v231_v18 = vpop.f32.mrf.mxu2 }
 0x13a   :  { %v254_v19 = vpop.f32.mrf.mxu3  ;;  %v232_v20 = vadd.f32 %v354_v17, %v231_v18 }
 0x13c   :  { %v255_v21 = vadd.f32 %v254_v19, %v232_v20 }
 0x13e   :  { %v260_v22 = vadd.f32 %v255_v21, %v88_v51 }
 0x140   :  { %264 = vadd.xlane.f32.xlu0 %v260_v22 }
 0x141   :  { %v234_v23 = vpop.f32.mrf.mxu2 }
 0x142   :  { %v257_v24 = vpop.f32.mrf.mxu3  ;;  %v235_v25 = vadd.f32 %v354_v17, %v234_v23 }
 0x144   :  { %v258_v26 = vadd.f32 %v257_v24, %v235_v25 }
 0x146   :  { %v261_v27 = vadd.f32 %v258_v26, %v89_v58 }
 0x148   :  { %266 = vadd.xlane.f32.xlu0 %v261_v27 }
 0x1b3   :  { %v265_v35 = vpop.xlane.xlu0 %264 }
 0x1b4   :  { %v275_v36 = vmul.f32 %v274_v34, %v265_v35 }
 0x1b6   :  { %v277_v37 = vsub.f32 %v260_v22, %v275_v36 }
 0x1b8   :  { %v279_v38 = vmul.f32 %v277_v37, %v277_v37 }
 0x1ba   :  { %281 = vadd.xlane.f32.xlu1 %v279_v38 }
 0x1bb   :  { %v267_v39 = vpop.xlane.xlu0 %266 }
 0x1bc   :  { %v276_v40 = vmul.f32 %v274_v34, %v267_v39 }
 0x1be   :  { %v278_v41 = vsub.f32 %v261_v27, %v276_v40 }
 0x1c0   :  { %v280_v42 = vmul.f32 %v278_v41, %v278_v41 }
 0x1c2   :  { %283 = vadd.xlane.f32.xlu1 %v280_v42 }
 0x22d   :  { %v282_v43 = vpop.xlane.xlu1 %281 }
 0x22e   :  { %v285_v44 = vmul.f32 %v282_v43, %v274_v34 }
 0x230   :  { %v287_v45 = vadd.f32 1e-06, %v285_v44 }
 0x232   :  { %359 = vrsqrt.f32 %v287_v45  ;;  %vm295_vm2 = vweird.f32 %v287_v45 }
 0x235   :  { %v284_v46 = vpop.xlane.xlu1 %283 }
 0x236   :  { %v286_v47 = vmul.f32 %v284_v46, %v274_v34 }
 0x238   :  { %v360_v48 = vpop.eup %359  ;;  %v288_v49 = vadd.f32 1e-06, %v286_v47 }
 0x239   :  { %v290_v50 = vmul.f32 %v360_v48, %v287_v45  ;;  %vm296_vm1 = vweird.f32 %v360_v48 }
 0x23a   :  { %361 = vrsqrt.f32 %v288_v49  ;;  %vm297_vm3 = vmor %vm295_vm2, %vm296_vm1  ;;  %vm305_vm5 = vweird.f32 %v288_v49 }
 0x23b   :  { %v291_v51 = vmul.f32 %v360_v48, %v290_v50 }
 0x23d   :  { %v292_v52 = vmul.f32 0.5, %v291_v51 }
 0x23f   :  { %v293_v53 = vsub.f32 1.5, %v292_v52 }
 0x240   :  { %v362_v54 = vpop.eup %361 }
 0x241   :  { %v294_v55 = vmul.f32 %v360_v48, %v293_v53  ;;  %v300_v56 = vmul.f32 %v362_v54, %v288_v49  ;;  %vm306_vm4 = vweird.f32 %v362_v54 }
 0x242   :  { %vm307_vm6 = vmor %vm305_vm5, %vm306_vm4 }
 0x243   :  { %v298_v58 = vsel %vm297_vm3, %v360_v48, %v294_v55  ;;  %v301_v59 = vmul.f32 %v362_v54, %v300_v56 }
 0x244   :  { %v309_v60 = vmul.f32 %v298_v58, %v277_v37 }
 0x245   :  { %v302_v62 = vmul.f32 0.5, %v301_v59 }
 0x246   :  { %v314_v63 = vmul.f32 %v355_v57, %v309_v60 }
 0x247   :  { %v303_v0 = vsub.f32 1.5, %v302_v62 }
 0x248   :  { %v319_v1 = vadd.f32 %v356_v61, %v314_v63 }
 0x249   :  { %v304_v2 = vmul.f32 %v362_v54, %v303_v0 }
 0x24a   :  { %321 = vst [vmem:[#allocation10] sm:$0xff] %v319_v1 }
 0x24b   :  { %v308_v3 = vsel %vm307_vm6, %v362_v54, %v304_v2 }
 0x24c   :  { %v310_v4 = vmul.f32 %v308_v3, %v278_v41 }
 0x24e   :  { %v315_v5 = vmul.f32 %v355_v57, %v310_v4 }
 0x250   :  { %v320_v6 = vadd.f32 %v356_v61, %v315_v5 }
 0x252   :  { %322 = vst [vmem:[#allocation10 + $0x8] sm:$0xff] %v320_v6 }
 0x253   :  { %335 = dma.vmem_to_hbm [thread:$0]  %s328_s5, 256, %s330_s29, [#allocation4], %s495_s13, %s495_s13, %s496_s14  }
 0x254   :  { %489 = dma.done.wait [#allocation4], 256  }
 0x255   :  { %490 = vsyncadd [#allocation4], 4294967040 }
 0x256   :  { %340 = vsyncpa [#allocation3], 1 }
 0x257   :  { %341 = vsyncpa [#allocation6], 1 }
 0x258   :  { %342 = vsyncpa [#allocation9], 1 }
 0x259   :  { %343 = vsyncpa [#allocation4], 1 }

</bundles_post_ra>
